<compile_context>
chip_gen: v5e
topology: v5e:2x2
jax: 0.10.0
libtpu: 0.0.40
codegen_flags: <defaults>
</compile_context>

<pallas_src>
import functools

import jax
import jax.numpy as jnp
from jax import lax
from jax.experimental import pallas as pl
from jax.experimental.pallas import tpu as pltpu


# ---------------------------------------------------------------------------
# Small hardware-aware helpers
# ---------------------------------------------------------------------------

def _mxu_lane_target():
    """256-wide head blocks on v6e/v7x (256x256 MXU); 128 on v5e and older."""
    try:
        kind = jax.devices()[0].device_kind.lower()
    except Exception:
        return 256
    for old in ("v2", "v3", "v4", "v5"):
        if old in kind:
            return 128
    return 256


def _vmem_limit_bytes():
    """Raise the scoped VMEM limit above the 16/32 MiB defaults while leaving
    headroom below physical capacity (128 MiB v5e/v6e, 64 MiB per core v7x)."""
    try:
        cap = int(pltpu.get_tpu_info().vmem_capacity_bytes)
    except Exception:
        cap = 64 * 1024 * 1024
    return int(min((cap * 7) // 8, 100 * 1024 * 1024))


def _heads_per_block(n_heads, d_k, lane_target=256):
    """Smallest head-group size g (dividing n_heads) whose block width g*d_k is
    a multiple of the MXU/lane target; falls back to 128-lane alignment, then
    to all heads (block width == d_model == full array dim, always legal)."""
    for lane in (lane_target, 128):
        for g in range(1, n_heads + 1):
            if n_heads % g == 0 and (g * d_k) % lane == 0:
                return g
    return n_heads


def _pick_tile(n, target):
    """Largest sequence tile <= target that divides n and is a multiple of 8
    (or n itself, which is always a legal block size)."""
    if n <= target:
        return n
    for t in range(target, 7, -1):
        if n % t == 0 and t % 8 == 0:
            return t
    return n


# ---------------------------------------------------------------------------
# Kernel
# ---------------------------------------------------------------------------

def _mha_flash_kernel(hpb, d_k, scale,
                      xq_ref, xk_ref, xv_ref,
                      wq_ref, bq_ref, wk_ref, bk_ref, wv_ref, bv_ref,
                      o_ref,
                      q_scr, m_scr, l_scr, acc_scr):
    f32, bf16 = jnp.float32, jnp.bfloat16
    kv = pl.program_id(3)

    @pl.when(kv == 0)
    def _init():
        # Project this q-row block once per (batch, head_block, q_block);
        # 1/sqrt(d_k) is folded into Q instead of scaling the (tq, tkv) scores.
        qg = (jnp.dot(xq_ref[...], wq_ref[...], preferred_element_type=f32)
              + bq_ref[...]) * scale
        q_scr[...] = qg.astype(bf16)
        m_scr[...] = jnp.full_like(m_scr, -jnp.inf)
        l_scr[...] = jnp.zeros_like(l_scr)
        acc_scr[...] = jnp.zeros_like(acc_scr)

    # Lane-dense K/V projections for this kv block (full MXU output width).
    kg = (jnp.dot(xk_ref[...], wk_ref[...], preferred_element_type=f32)
          + bk_ref[...]).astype(bf16)
    vg = (jnp.dot(xv_ref[...], wv_ref[...], preferred_element_type=f32)
          + bv_ref[...]).astype(bf16)
    qg = q_scr[...]

    # Per-head online softmax.  With flash tiling each iteration only keeps
    # (tq, tkv)-sized temporaries live, so the small static unroll (hpb = hb/d_k)
    # is VMEM-safe; all softmax/VPU math stays f32 (v5e has no bf16 VPU/EUP).
    for h in range(hpb):
        sl = slice(h * d_k, (h + 1) * d_k)
        qh, kh, vh = qg[:, sl], kg[:, sl], vg[:, sl]
        # Contract last dims directly -> no K transpose materialized in VMEM.
        s = lax.dot_general(qh, kh, (((1,), (1,)), ((), ())),
                            preferred_element_type=f32)          # (tq, tkv)
        m_prev = m_scr[h]                                          # (tq, 1)
        m_new = jnp.maximum(m_prev, jnp.max(s, axis=-1, keepdims=True))
        alpha = jnp.exp(m_prev - m_new)
        p = jnp.exp(s - m_new)
        l_scr[h] = alpha * l_scr[h] + jnp.sum(p, axis=-1, keepdims=True)
        acc_scr[h] = alpha * acc_scr[h] + jnp.dot(
            p.astype(bf16), vh, preferred_element_type=f32)
        m_scr[h] = m_new

    @pl.when(kv == pl.num_programs(3) - 1)
    def _finalize():
        outs = []
        for h in range(hpb):
            inv_l = pl.reciprocal(l_scr[h], approx=True)
            outs.append(acc_scr[h] * inv_l)
        out = outs[0] if hpb == 1 else jnp.concatenate(outs, axis=-1)
        # Single lane-dense (tq, hb) store (no masked per-head column stores).
        o_ref[...] = out.astype(o_ref.dtype)


# ---------------------------------------------------------------------------
# Wrapper
# ---------------------------------------------------------------------------

def prepare_params(torch_params):
    """One-time conversion from the PyTorch nn.Linear layout
    (w: (D, D), y = x @ w.T + b) to kernel layout
    (w_t: (D, D) bf16 with y = x @ w_t; b: (1, D) f32)."""
    prep = {}
    for n in ("q", "k", "v"):
        if f"w{n}" in torch_params:
            prep[f"w{n}_t"] = jnp.asarray(torch_params[f"w{n}"]).T.astype(jnp.bfloat16)
            prep[f"b{n}"] = jnp.asarray(torch_params[f"b{n}"]).reshape(1, -1).astype(jnp.float32)
    return prep


def multi_head_attention(prep, q, k, v, *, n_heads, kq_same=False,
                         q_tile=256, kv_tile=512, out_dtype=None):
    """Pallas implementation of MultiHeadAttention.forward (mask=None)."""
    B, L, D = q.shape
    assert k.shape == (B, L, D) and v.shape == (B, L, D)
    assert D % n_heads == 0
    d_k = D // n_heads
    scale = 1.0 / float(d_k) ** 0.5
    out_dtype = out_dtype or q.dtype

    hpb = _heads_per_block(n_heads, d_k, _mxu_lane_target())
    n_hblk = n_heads // hpb
    hb = hpb * d_k                          # head-block width along D

    tq = _pick_tile(L, q_tile)
    tkv = _pick_tile(L, kv_tile)
    n_qblk, n_kvblk = L // tq, L // tkv

    # bf16 activations at the pallas_call boundary: halves activation HBM DMA
    # and resident VMEM; MXU accumulation stays f32 inside the kernel.
    qb, kb, vb = (x.astype(jnp.bfloat16) for x in (q, k, v))

    wq_t, bq = (prep["wk_t"], prep["bk"]) if kq_same else (prep["wq_t"], prep["bq"])
    wk_t, bk = prep["wk_t"], prep["bk"]
    wv_t, bv = prep["wv_t"], prep["bv"]

    xq_spec = pl.BlockSpec((None, tq, D), lambda b, h, i, j: (b, i, 0))
    xkv_spec = pl.BlockSpec((None, tkv, D), lambda b, h, i, j: (b, j, 0))
    w_spec = pl.BlockSpec((D, hb), lambda b, h, i, j: (0, h))   # resident over (i, j)
    b_spec = pl.BlockSpec((1, hb), lambda b, h, i, j: (0, h))
    o_spec = pl.BlockSpec((None, tq, hb), lambda b, h, i, j: (b, i, h))

    # Bias the megacore split toward the batch axis when B >= 2 (v7x: avoids
    # both cores fetching identical activation blocks).
    if B >= 2:
        dims = ("parallel", "arbitrary", "arbitrary", "arbitrary")
    else:
        dims = ("parallel", "parallel", "parallel", "arbitrary")

    flops = 2 * B * L * D * D * (2 if kq_same else 3) + 4 * B * n_heads * L * L * d_k
    transcendentals = B * n_heads * L * L
    bytes_accessed = (3 * B * L * D * 2 + 3 * D * D * 2
                      + B * L * D * jnp.dtype(out_dtype).itemsize)

    return pl.pallas_call(
        functools.partial(_mha_flash_kernel, hpb, d_k, scale),
        grid=(B, n_hblk, n_qblk, n_kvblk),
        in_specs=[xq_spec, xkv_spec, xkv_spec,
                  w_spec, b_spec, w_spec, b_spec, w_spec, b_spec],
        out_specs=o_spec,
        out_shape=jax.ShapeDtypeStruct((B, L, D), out_dtype),
        scratch_shapes=[
            pltpu.VMEM((tq, hb), jnp.bfloat16),        # cached projected Q
            pltpu.VMEM((hpb, tq, 1), jnp.float32),     # running max
            pltpu.VMEM((hpb, tq, 1), jnp.float32),     # running denominator
            pltpu.VMEM((hpb, tq, d_k), jnp.float32),   # running numerator
        ],
        compiler_params=pltpu.CompilerParams(
            dimension_semantics=dims,
            vmem_limit_bytes=_vmem_limit_bytes()),
        cost_estimate=pl.CostEstimate(
            flops=int(flops),
            transcendentals=int(transcendentals),
            bytes_accessed=int(bytes_accessed)),
    )(qb, kb, vb, wq_t, bq, wk_t, bk, wv_t, bv)


# ---------------------------------------------------------------------------
# Pure-JAX f32 reference mirroring the PyTorch forward (mask=None)
# ---------------------------------------------------------------------------

def _reference(params, q, k, v, *, n_heads, kq_same=False):
    B, L, D = q.shape
    d_k = D // n_heads
    wq = params["wk"] if kq_same else params["wq"]
    bq = params["bk"] if kq_same else params["bq"]

    def lin(x, w, b):
        return x @ w.T + b

    def split(x):
        return x.reshape(B, L, n_heads, d_k).transpose(0, 2, 1, 3)

    qh = split(lin(q, wq, bq))
    kh = split(lin(k, params["wk"], params["bk"]))
    vh = split(lin(v, params["wv"], params["bv"]))
    scores = jnp.einsum("bhqd,bhkd->bhqk", qh, kh) / d_k ** 0.5
    scores = jax.nn.softmax(scores - jnp.max(scores), axis=-1)
    out = jnp.einsum("bhqk,bhkd->bhqd", scores, vh)
    return out.transpose(0, 2, 1, 3).reshape(B, L, D)


if __name__ == "__main__":
    def make_case(case_key, B, L, D, wscale):
        ks = jax.random.split(case_key, 9)
        init = lambda kk, shape: jax.random.normal(kk, shape, jnp.float32) * wscale
        params = {
            "wq": init(ks[0], (D, D)), "bq": init(ks[1], (D,)),
            "wk": init(ks[2], (D, D)), "bk": init(ks[3], (D,)),
            "wv": init(ks[4], (D, D)), "bv": init(ks[5], (D,)),
        }
        q = jax.random.normal(ks[6], (B, L, D), jnp.float32)
        k = jax.random.normal(ks[7], (B, L, D), jnp.float32)
        v = jax.random.normal(ks[8], (B, L, D), jnp.float32)
        return params, q, k, v

    key = jax.random.PRNGKey(0)
    k1, k2 = jax.random.split(key)

    # Case 1: small module-like shapes (B=2, L=8, d_model=32, heads=4), both
    # kq_same settings.  Single q/kv block (full-L tiles).
    params, q, kin, v = make_case(k1, 2, 8, 32, 0.05)
    prep = prepare_params(params)
    for kq_same in (False, True):
        out = jax.block_until_ready(
            multi_head_attention(prep, q, kin, v, n_heads=4, kq_same=kq_same))
        ref = _reference(params, q, kin, v, n_heads=4, kq_same=kq_same)
        assert out.shape == ref.shape
        assert jnp.allclose(out, ref, atol=2e-2, rtol=2e-2), "mismatch (case 1)"

    # Case 2: larger shapes forcing the flash path (multiple q and kv blocks,
    # online-softmax accumulation across the kv grid axis).
    params, q, kin, v = make_case(k2, 2, 512, 256, 0.1)
    prep = prepare_params(params)
    out = jax.block_until_ready(
        multi_head_attention(prep, q, kin, v, n_heads=4,
                             q_tile=128, kv_tile=128))
    ref = _reference(params, q, kin, v, n_heads=4)
    # bf16 MXU matmuls + approx reciprocal vs the pure-f32 reference.
    assert jnp.allclose(out, ref, atol=5e-2, rtol=5e-2), "mismatch (case 2)"

    print("KERNEL_OK")
</pallas_src>

<mosaic_0001>
module attributes {stable_mosaic.version = 11 : i64} {
  func.func @_mha_flash_kernel(%arg0: i32, %arg1: i32, %arg2: i32, %arg3: i32, %arg4: memref<1x8x32xbf16, #tpu.memory_space<vmem>>, %arg5: memref<1x8x32xbf16, #tpu.memory_space<vmem>>, %arg6: memref<1x8x32xbf16, #tpu.memory_space<vmem>>, %arg7: memref<32x32xbf16, #tpu.memory_space<vmem>>, %arg8: memref<1x32xf32, #tpu.memory_space<vmem>>, %arg9: memref<32x32xbf16, #tpu.memory_space<vmem>>, %arg10: memref<1x32xf32, #tpu.memory_space<vmem>>, %arg11: memref<32x32xbf16, #tpu.memory_space<vmem>>, %arg12: memref<1x32xf32, #tpu.memory_space<vmem>>, %arg13: memref<1x8x32xf32, #tpu.memory_space<vmem>>, %arg14: memref<8x32xbf16, #tpu.memory_space<vmem>>, %arg15: memref<4x8x1xf32, #tpu.memory_space<vmem>>, %arg16: memref<4x8x1xf32, #tpu.memory_space<vmem>>, %arg17: memref<4x8x8xf32, #tpu.memory_space<vmem>>) attributes {dimension_semantics = [#tpu.dimension_semantics<parallel>, #tpu.dimension_semantics<arbitrary>, #tpu.dimension_semantics<arbitrary>, #tpu.dimension_semantics<arbitrary>], iteration_bounds = array<i64: 2, 1, 1, 1>, scalar_prefetch = 0 : i64, scratch_operands = 4 : i64, tpu.core_type = #tpu.core_type<tc>, window_params = [{transform_indices = @transform_0, window_bounds = array<i64: 1, 8, 32>}, {transform_indices = @transform_1, window_bounds = array<i64: 1, 8, 32>}, {transform_indices = @transform_2, window_bounds = array<i64: 1, 8, 32>}, {transform_indices = @transform_3, window_bounds = array<i64: 32, 32>}, {transform_indices = @transform_4, window_bounds = array<i64: 1, 32>}, {transform_indices = @transform_5, window_bounds = array<i64: 32, 32>}, {transform_indices = @transform_6, window_bounds = array<i64: 1, 32>}, {transform_indices = @transform_7, window_bounds = array<i64: 32, 32>}, {transform_indices = @transform_8, window_bounds = array<i64: 1, 32>}, {transform_indices = @transform_9, window_bounds = array<i64: 1, 8, 32>}]} {
    %c0_i32 = arith.constant 0 : i32
    %0 = arith.cmpi eq, %arg3, %c0_i32 : i32
    %1 = arith.extui %0 : i1 to i32
    %c0_i32_0 = arith.constant 0 : i32
    %2 = arith.cmpi ne, %1, %c0_i32_0 : i32
    scf.if %2 {
      %c0_104 = arith.constant 0 : index
      %c0_105 = arith.constant 0 : index
      %c0_106 = arith.constant 0 : index
      %167 = vector.load %arg4[%c0_104, %c0_105, %c0_106] : memref<1x8x32xbf16, #tpu.memory_space<vmem>>, vector<1x8x32xbf16>
      %168 = vector.shape_cast %167 : vector<1x8x32xbf16> to vector<8x32xbf16>
      %c0_107 = arith.constant 0 : index
      %c0_108 = arith.constant 0 : index
      %169 = vector.load %arg7[%c0_107, %c0_108] : memref<32x32xbf16, #tpu.memory_space<vmem>>, vector<32x32xbf16>
      %cst_109 = arith.constant dense<0.000000e+00> : vector<8x32xf32>
      %170 = tpu.matmul %168, %169, %cst_109 {dimension_numbers = #tpu.dot_dimension_numbers<[1], [0], [0], [1], [0, 0, 1, 1], [], []>} : vector<8x32xbf16>, vector<32x32xbf16>, vector<8x32xf32> -> vector<8x32xf32>
      %c0_110 = arith.constant 0 : index
      %c0_111 = arith.constant 0 : index
      %171 = vector.load %arg8[%c0_110, %c0_111] : memref<1x32xf32, #tpu.memory_space<vmem>>, vector<1x32xf32>
      %172 = vector.broadcast %171 : vector<1x32xf32> to vector<8x32xf32>
      %173 = arith.addf %170, %172 : vector<8x32xf32>
      %cst_112 = arith.constant 0.353553385 : f32
      %174 = vector.broadcast %cst_112 : f32 to vector<8x32xf32>
      %175 = arith.mulf %173, %174 : vector<8x32xf32>
      %176 = arith.truncf %175 : vector<8x32xf32> to vector<8x32xbf16>
      %c0_113 = arith.constant 0 : index
      %c0_114 = arith.constant 0 : index
      %177 = vector.load %arg14[%c0_113, %c0_114] : memref<8x32xbf16, #tpu.memory_space<vmem>>, vector<8x32xbf16>
      tpu.vector_store %arg14[%c0_113, %c0_114], %176 {strides = array<i32>} : memref<8x32xbf16, #tpu.memory_space<vmem>>, vector<8x32xbf16>,
      %cst_115 = arith.constant 0xFF800000 : f32
      %178 = vector.broadcast %cst_115 : f32 to vector<4x8x1xf32>
      %c0_116 = arith.constant 0 : index
      %c0_117 = arith.constant 0 : index
      %c0_118 = arith.constant 0 : index
      %179 = vector.load %arg15[%c0_116, %c0_117, %c0_118] : memref<4x8x1xf32, #tpu.memory_space<vmem>>, vector<4x8x1xf32>
      tpu.vector_store %arg15[%c0_116, %c0_117, %c0_118], %178 {strides = array<i32>} : memref<4x8x1xf32, #tpu.memory_space<vmem>>, vector<4x8x1xf32>,
      %cst_119 = arith.constant 0.000000e+00 : f32
      %180 = vector.broadcast %cst_119 : f32 to vector<4x8x1xf32>
      %c0_120 = arith.constant 0 : index
      %c0_121 = arith.constant 0 : index
      %c0_122 = arith.constant 0 : index
      %181 = vector.load %arg16[%c0_120, %c0_121, %c0_122] : memref<4x8x1xf32, #tpu.memory_space<vmem>>, vector<4x8x1xf32>
      tpu.vector_store %arg16[%c0_120, %c0_121, %c0_122], %180 {strides = array<i32>} : memref<4x8x1xf32, #tpu.memory_space<vmem>>, vector<4x8x1xf32>,
      %cst_123 = arith.constant 0.000000e+00 : f32
      %182 = vector.broadcast %cst_123 : f32 to vector<4x8x8xf32>
      %c0_124 = arith.constant 0 : index
      %c0_125 = arith.constant 0 : index
      %c0_126 = arith.constant 0 : index
      %183 = vector.load %arg17[%c0_124, %c0_125, %c0_126] : memref<4x8x8xf32, #tpu.memory_space<vmem>>, vector<4x8x8xf32>
      tpu.vector_store %arg17[%c0_124, %c0_125, %c0_126], %182 {strides = array<i32>} : memref<4x8x8xf32, #tpu.memory_space<vmem>>, vector<4x8x8xf32>,
    } else {
    }
    %c0 = arith.constant 0 : index
    %c0_1 = arith.constant 0 : index
    %c0_2 = arith.constant 0 : index
    %3 = vector.load %arg5[%c0, %c0_1, %c0_2] : memref<1x8x32xbf16, #tpu.memory_space<vmem>>, vector<1x8x32xbf16>
    %4 = vector.shape_cast %3 : vector<1x8x32xbf16> to vector<8x32xbf16>
    %c0_3 = arith.constant 0 : index
    %c0_4 = arith.constant 0 : index
    %5 = vector.load %arg9[%c0_3, %c0_4] : memref<32x32xbf16, #tpu.memory_space<vmem>>, vector<32x32xbf16>
    %cst = arith.constant dense<0.000000e+00> : vector<8x32xf32>
    %6 = tpu.matmul %4, %5, %cst {dimension_numbers = #tpu.dot_dimension_numbers<[1], [0], [0], [1], [0, 0, 1, 1], [], []>} : vector<8x32xbf16>, vector<32x32xbf16>, vector<8x32xf32> -> vector<8x32xf32>
    %c0_5 = arith.constant 0 : index
    %c0_6 = arith.constant 0 : index
    %7 = vector.load %arg10[%c0_5, %c0_6] : memref<1x32xf32, #tpu.memory_space<vmem>>, vector<1x32xf32>
    %8 = vector.broadcast %7 : vector<1x32xf32> to vector<8x32xf32>
    %9 = arith.addf %6, %8 : vector<8x32xf32>
    %10 = arith.truncf %9 : vector<8x32xf32> to vector<8x32xbf16>
    %c0_7 = arith.constant 0 : index
    %c0_8 = arith.constant 0 : index
    %c0_9 = arith.constant 0 : index
    %11 = vector.load %arg6[%c0_7, %c0_8, %c0_9] : memref<1x8x32xbf16, #tpu.memory_space<vmem>>, vector<1x8x32xbf16>
    %12 = vector.shape_cast %11 : vector<1x8x32xbf16> to vector<8x32xbf16>
    %c0_10 = arith.constant 0 : index
    %c0_11 = arith.constant 0 : index
    %13 = vector.load %arg11[%c0_10, %c0_11] : memref<32x32xbf16, #tpu.memory_space<vmem>>, vector<32x32xbf16>
    %cst_12 = arith.constant dense<0.000000e+00> : vector<8x32xf32>
    %14 = tpu.matmul %12, %13, %cst_12 {dimension_numbers = #tpu.dot_dimension_numbers<[1], [0], [0], [1], [0, 0, 1, 1], [], []>} : vector<8x32xbf16>, vector<32x32xbf16>, vector<8x32xf32> -> vector<8x32xf32>
    %c0_13 = arith.constant 0 : index
    %c0_14 = arith.constant 0 : index
    %15 = vector.load %arg12[%c0_13, %c0_14] : memref<1x32xf32, #tpu.memory_space<vmem>>, vector<1x32xf32>
    %16 = vector.broadcast %15 : vector<1x32xf32> to vector<8x32xf32>
    %17 = arith.addf %14, %16 : vector<8x32xf32>
    %18 = arith.truncf %17 : vector<8x32xf32> to vector<8x32xbf16>
    %c0_15 = arith.constant 0 : index
    %c0_16 = arith.constant 0 : index
    %19 = vector.load %arg14[%c0_15, %c0_16] : memref<8x32xbf16, #tpu.memory_space<vmem>>, vector<8x32xbf16>
    %20 = vector.extract_strided_slice %19 {offsets = [0, 0], sizes = [8, 8], strides = [1, 1]} : vector<8x32xbf16> to vector<8x8xbf16>
    %21 = vector.extract_strided_slice %10 {offsets = [0, 0], sizes = [8, 8], strides = [1, 1]} : vector<8x32xbf16> to vector<8x8xbf16>
    %22 = vector.extract_strided_slice %18 {offsets = [0, 0], sizes = [8, 8], strides = [1, 1]} : vector<8x32xbf16> to vector<8x8xbf16>
    %cst_17 = arith.constant dense<0.000000e+00> : vector<8x8xf32>
    %23 = tpu.matmul %20, %21, %cst_17 {dimension_numbers = #tpu.dot_dimension_numbers<[1], [1], [0], [0], [0, 0, 1, 0], [], []>} : vector<8x8xbf16>, vector<8x8xbf16>, vector<8x8xf32> -> vector<8x8xf32>
    %c0_18 = arith.constant 0 : index
    %c0_19 = arith.constant 0 : index
    %c0_20 = arith.constant 0 : index
    %24 = vector.load %arg15[%c0_18, %c0_19, %c0_20] : memref<4x8x1xf32, #tpu.memory_space<vmem>>, vector<1x8x1xf32>
    %25 = vector.shape_cast %24 : vector<1x8x1xf32> to vector<8x1xf32>
    %cst_21 = arith.constant dense<0xFF800000> : vector<8xf32>
    %26 = vector.multi_reduction <maximumf>, %23, %cst_21 [1] : vector<8x8xf32> to vector<8xf32>
    %27 = vector.shape_cast %26 : vector<8xf32> to vector<8x1xf32>
    %28 = arith.maximumf %25, %27 : vector<8x1xf32>
    %29 = arith.subf %25, %28 : vector<8x1xf32>
    %30 = math.exp %29 : vector<8x1xf32>
    %31 = vector.broadcast %28 : vector<8x1xf32> to vector<8x8xf32>
    %32 = arith.subf %23, %31 : vector<8x8xf32>
    %33 = math.exp %32 : vector<8x8xf32>
    %c0_22 = arith.constant 0 : index
    %c0_23 = arith.constant 0 : index
    %c0_24 = arith.constant 0 : index
    %34 = vector.load %arg16[%c0_22, %c0_23, %c0_24] : memref<4x8x1xf32, #tpu.memory_space<vmem>>, vector<1x8x1xf32>
    %35 = vector.shape_cast %34 : vector<1x8x1xf32> to vector<8x1xf32>
    %36 = arith.mulf %30, %35 : vector<8x1xf32>
    %cst_25 = arith.constant dense<0.000000e+00> : vector<8xf32>
    %37 = vector.multi_reduction <add>, %33, %cst_25 [1] : vector<8x8xf32> to vector<8xf32>
    %38 = vector.shape_cast %37 : vector<8xf32> to vector<8x1xf32>
    %39 = arith.addf %36, %38 : vector<8x1xf32>
    %c0_26 = arith.constant 0 : index
    %c0_27 = arith.constant 0 : index
    %c0_28 = arith.constant 0 : index
    %40 = vector.load %arg16[%c0_26, %c0_27, %c0_28] : memref<4x8x1xf32, #tpu.memory_space<vmem>>, vector<1x8x1xf32>
    %41 = vector.shape_cast %40 : vector<1x8x1xf32> to vector<8x1xf32>
    %42 = vector.shape_cast %39 : vector<8x1xf32> to vector<1x8x1xf32>
    tpu.vector_store %arg16[%c0_26, %c0_27, %c0_28], %42 {strides = array<i32>} : memref<4x8x1xf32, #tpu.memory_space<vmem>>, vector<1x8x1xf32>,
    %c0_29 = arith.constant 0 : index
    %c0_30 = arith.constant 0 : index
    %c0_31 = arith.constant 0 : index
    %43 = vector.load %arg17[%c0_29, %c0_30, %c0_31] : memref<4x8x8xf32, #tpu.memory_space<vmem>>, vector<1x8x8xf32>
    %44 = vector.shape_cast %43 : vector<1x8x8xf32> to vector<8x8xf32>
    %45 = vector.broadcast %30 : vector<8x1xf32> to vector<8x8xf32>
    %46 = arith.mulf %45, %44 : vector<8x8xf32>
    %47 = arith.truncf %33 : vector<8x8xf32> to vector<8x8xbf16>
    %cst_32 = arith.constant dense<0.000000e+00> : vector<8x8xf32>
    %48 = tpu.matmul %47, %22, %cst_32 {dimension_numbers = #tpu.dot_dimension_numbers<[1], [0], [0], [1], [0, 0, 1, 1], [], []>} : vector<8x8xbf16>, vector<8x8xbf16>, vector<8x8xf32> -> vector<8x8xf32>
    %49 = arith.addf %46, %48 : vector<8x8xf32>
    %c0_33 = arith.constant 0 : index
    %c0_34 = arith.constant 0 : index
    %c0_35 = arith.constant 0 : index
    %50 = vector.load %arg17[%c0_33, %c0_34, %c0_35] : memref<4x8x8xf32, #tpu.memory_space<vmem>>, vector<1x8x8xf32>
    %51 = vector.shape_cast %50 : vector<1x8x8xf32> to vector<8x8xf32>
    %52 = vector.shape_cast %49 : vector<8x8xf32> to vector<1x8x8xf32>
    tpu.vector_store %arg17[%c0_33, %c0_34, %c0_35], %52 {strides = array<i32>} : memref<4x8x8xf32, #tpu.memory_space<vmem>>, vector<1x8x8xf32>,
    %c0_36 = arith.constant 0 : index
    %c0_37 = arith.constant 0 : index
    %c0_38 = arith.constant 0 : index
    %53 = vector.load %arg15[%c0_36, %c0_37, %c0_38] : memref<4x8x1xf32, #tpu.memory_space<vmem>>, vector<1x8x1xf32>
    %54 = vector.shape_cast %53 : vector<1x8x1xf32> to vector<8x1xf32>
    %55 = vector.shape_cast %28 : vector<8x1xf32> to vector<1x8x1xf32>
    tpu.vector_store %arg15[%c0_36, %c0_37, %c0_38], %55 {strides = array<i32>} : memref<4x8x1xf32, #tpu.memory_space<vmem>>, vector<1x8x1xf32>,
    %56 = vector.extract_strided_slice %19 {offsets = [0, 8], sizes = [8, 8], strides = [1, 1]} : vector<8x32xbf16> to vector<8x8xbf16>
    %57 = vector.extract_strided_slice %10 {offsets = [0, 8], sizes = [8, 8], strides = [1, 1]} : vector<8x32xbf16> to vector<8x8xbf16>
    %58 = vector.extract_strided_slice %18 {offsets = [0, 8], sizes = [8, 8], strides = [1, 1]} : vector<8x32xbf16> to vector<8x8xbf16>
    %cst_39 = arith.constant dense<0.000000e+00> : vector<8x8xf32>
    %59 = tpu.matmul %56, %57, %cst_39 {dimension_numbers = #tpu.dot_dimension_numbers<[1], [1], [0], [0], [0, 0, 1, 0], [], []>} : vector<8x8xbf16>, vector<8x8xbf16>, vector<8x8xf32> -> vector<8x8xf32>
    %c1 = arith.constant 1 : index
    %c0_40 = arith.constant 0 : index
    %c0_41 = arith.constant 0 : index
    %60 = vector.load %arg15[%c1, %c0_40, %c0_41] : memref<4x8x1xf32, #tpu.memory_space<vmem>>, vector<1x8x1xf32>
    %61 = vector.shape_cast %60 : vector<1x8x1xf32> to vector<8x1xf32>
    %cst_42 = arith.constant dense<0xFF800000> : vector<8xf32>
    %62 = vector.multi_reduction <maximumf>, %59, %cst_42 [1] : vector<8x8xf32> to vector<8xf32>
    %63 = vector.shape_cast %62 : vector<8xf32> to vector<8x1xf32>
    %64 = arith.maximumf %61, %63 : vector<8x1xf32>
    %65 = arith.subf %61, %64 : vector<8x1xf32>
    %66 = math.exp %65 : vector<8x1xf32>
    %67 = vector.broadcast %64 : vector<8x1xf32> to vector<8x8xf32>
    %68 = arith.subf %59, %67 : vector<8x8xf32>
    %69 = math.exp %68 : vector<8x8xf32>
    %c1_43 = arith.constant 1 : index
    %c0_44 = arith.constant 0 : index
    %c0_45 = arith.constant 0 : index
    %70 = vector.load %arg16[%c1_43, %c0_44, %c0_45] : memref<4x8x1xf32, #tpu.memory_space<vmem>>, vector<1x8x1xf32>
    %71 = vector.shape_cast %70 : vector<1x8x1xf32> to vector<8x1xf32>
    %72 = arith.mulf %66, %71 : vector<8x1xf32>
    %cst_46 = arith.constant dense<0.000000e+00> : vector<8xf32>
    %73 = vector.multi_reduction <add>, %69, %cst_46 [1] : vector<8x8xf32> to vector<8xf32>
    %74 = vector.shape_cast %73 : vector<8xf32> to vector<8x1xf32>
    %75 = arith.addf %72, %74 : vector<8x1xf32>
    %c1_47 = arith.constant 1 : index
    %c0_48 = arith.constant 0 : index
    %c0_49 = arith.constant 0 : index
    %76 = vector.load %arg16[%c1_47, %c0_48, %c0_49] : memref<4x8x1xf32, #tpu.memory_space<vmem>>, vector<1x8x1xf32>
    %77 = vector.shape_cast %76 : vector<1x8x1xf32> to vector<8x1xf32>
    %78 = vector.shape_cast %75 : vector<8x1xf32> to vector<1x8x1xf32>
    tpu.vector_store %arg16[%c1_47, %c0_48, %c0_49], %78 {strides = array<i32>} : memref<4x8x1xf32, #tpu.memory_space<vmem>>, vector<1x8x1xf32>,
    %c1_50 = arith.constant 1 : index
    %c0_51 = arith.constant 0 : index
    %c0_52 = arith.constant 0 : index
    %79 = vector.load %arg17[%c1_50, %c0_51, %c0_52] : memref<4x8x8xf32, #tpu.memory_space<vmem>>, vector<1x8x8xf32>
    %80 = vector.shape_cast %79 : vector<1x8x8xf32> to vector<8x8xf32>
    %81 = vector.broadcast %66 : vector<8x1xf32> to vector<8x8xf32>
    %82 = arith.mulf %81, %80 : vector<8x8xf32>
    %83 = arith.truncf %69 : vector<8x8xf32> to vector<8x8xbf16>
    %cst_53 = arith.constant dense<0.000000e+00> : vector<8x8xf32>
    %84 = tpu.matmul %83, %58, %cst_53 {dimension_numbers = #tpu.dot_dimension_numbers<[1], [0], [0], [1], [0, 0, 1, 1], [], []>} : vector<8x8xbf16>, vector<8x8xbf16>, vector<8x8xf32> -> vector<8x8xf32>
    %85 = arith.addf %82, %84 : vector<8x8xf32>
    %c1_54 = arith.constant 1 : index
    %c0_55 = arith.constant 0 : index
    %c0_56 = arith.constant 0 : index
    %86 = vector.load %arg17[%c1_54, %c0_55, %c0_56] : memref<4x8x8xf32, #tpu.memory_space<vmem>>, vector<1x8x8xf32>
    %87 = vector.shape_cast %86 : vector<1x8x8xf32> to vector<8x8xf32>
    %88 = vector.shape_cast %85 : vector<8x8xf32> to vector<1x8x8xf32>
    tpu.vector_store %arg17[%c1_54, %c0_55, %c0_56], %88 {strides = array<i32>} : memref<4x8x8xf32, #tpu.memory_space<vmem>>, vector<1x8x8xf32>,
    %c1_57 = arith.constant 1 : index
    %c0_58 = arith.constant 0 : index
    %c0_59 = arith.constant 0 : index
    %89 = vector.load %arg15[%c1_57, %c0_58, %c0_59] : memref<4x8x1xf32, #tpu.memory_space<vmem>>, vector<1x8x1xf32>
    %90 = vector.shape_cast %89 : vector<1x8x1xf32> to vector<8x1xf32>
    %91 = vector.shape_cast %64 : vector<8x1xf32> to vector<1x8x1xf32>
    tpu.vector_store %arg15[%c1_57, %c0_58, %c0_59], %91 {strides = array<i32>} : memref<4x8x1xf32, #tpu.memory_space<vmem>>, vector<1x8x1xf32>,
    %92 = vector.extract_strided_slice %19 {offsets = [0, 16], sizes = [8, 8], strides = [1, 1]} : vector<8x32xbf16> to vector<8x8xbf16>
    %93 = vector.extract_strided_slice %10 {offsets = [0, 16], sizes = [8, 8], strides = [1, 1]} : vector<8x32xbf16> to vector<8x8xbf16>
    %94 = vector.extract_strided_slice %18 {offsets = [0, 16], sizes = [8, 8], strides = [1, 1]} : vector<8x32xbf16> to vector<8x8xbf16>
    %cst_60 = arith.constant dense<0.000000e+00> : vector<8x8xf32>
    %95 = tpu.matmul %92, %93, %cst_60 {dimension_numbers = #tpu.dot_dimension_numbers<[1], [1], [0], [0], [0, 0, 1, 0], [], []>} : vector<8x8xbf16>, vector<8x8xbf16>, vector<8x8xf32> -> vector<8x8xf32>
    %c2 = arith.constant 2 : index
    %c0_61 = arith.constant 0 : index
    %c0_62 = arith.constant 0 : index
    %96 = vector.load %arg15[%c2, %c0_61, %c0_62] : memref<4x8x1xf32, #tpu.memory_space<vmem>>, vector<1x8x1xf32>
    %97 = vector.shape_cast %96 : vector<1x8x1xf32> to vector<8x1xf32>
    %cst_63 = arith.constant dense<0xFF800000> : vector<8xf32>
    %98 = vector.multi_reduction <maximumf>, %95, %cst_63 [1] : vector<8x8xf32> to vector<8xf32>
    %99 = vector.shape_cast %98 : vector<8xf32> to vector<8x1xf32>
    %100 = arith.maximumf %97, %99 : vector<8x1xf32>
    %101 = arith.subf %97, %100 : vector<8x1xf32>
    %102 = math.exp %101 : vector<8x1xf32>
    %103 = vector.broadcast %100 : vector<8x1xf32> to vector<8x8xf32>
    %104 = arith.subf %95, %103 : vector<8x8xf32>
    %105 = math.exp %104 : vector<8x8xf32>
    %c2_64 = arith.constant 2 : index
    %c0_65 = arith.constant 0 : index
    %c0_66 = arith.constant 0 : index
    %106 = vector.load %arg16[%c2_64, %c0_65, %c0_66] : memref<4x8x1xf32, #tpu.memory_space<vmem>>, vector<1x8x1xf32>
    %107 = vector.shape_cast %106 : vector<1x8x1xf32> to vector<8x1xf32>
    %108 = arith.mulf %102, %107 : vector<8x1xf32>
    %cst_67 = arith.constant dense<0.000000e+00> : vector<8xf32>
    %109 = vector.multi_reduction <add>, %105, %cst_67 [1] : vector<8x8xf32> to vector<8xf32>
    %110 = vector.shape_cast %109 : vector<8xf32> to vector<8x1xf32>
    %111 = arith.addf %108, %110 : vector<8x1xf32>
    %c2_68 = arith.constant 2 : index
    %c0_69 = arith.constant 0 : index
    %c0_70 = arith.constant 0 : index
    %112 = vector.load %arg16[%c2_68, %c0_69, %c0_70] : memref<4x8x1xf32, #tpu.memory_space<vmem>>, vector<1x8x1xf32>
    %113 = vector.shape_cast %112 : vector<1x8x1xf32> to vector<8x1xf32>
    %114 = vector.shape_cast %111 : vector<8x1xf32> to vector<1x8x1xf32>
    tpu.vector_store %arg16[%c2_68, %c0_69, %c0_70], %114 {strides = array<i32>} : memref<4x8x1xf32, #tpu.memory_space<vmem>>, vector<1x8x1xf32>,
    %c2_71 = arith.constant 2 : index
    %c0_72 = arith.constant 0 : index
    %c0_73 = arith.constant 0 : index
    %115 = vector.load %arg17[%c2_71, %c0_72, %c0_73] : memref<4x8x8xf32, #tpu.memory_space<vmem>>, vector<1x8x8xf32>
    %116 = vector.shape_cast %115 : vector<1x8x8xf32> to vector<8x8xf32>
    %117 = vector.broadcast %102 : vector<8x1xf32> to vector<8x8xf32>
    %118 = arith.mulf %117, %116 : vector<8x8xf32>
    %119 = arith.truncf %105 : vector<8x8xf32> to vector<8x8xbf16>
    %cst_74 = arith.constant dense<0.000000e+00> : vector<8x8xf32>
    %120 = tpu.matmul %119, %94, %cst_74 {dimension_numbers = #tpu.dot_dimension_numbers<[1], [0], [0], [1], [0, 0, 1, 1], [], []>} : vector<8x8xbf16>, vector<8x8xbf16>, vector<8x8xf32> -> vector<8x8xf32>
    %121 = arith.addf %118, %120 : vector<8x8xf32>
    %c2_75 = arith.constant 2 : index
    %c0_76 = arith.constant 0 : index
    %c0_77 = arith.constant 0 : index
    %122 = vector.load %arg17[%c2_75, %c0_76, %c0_77] : memref<4x8x8xf32, #tpu.memory_space<vmem>>, vector<1x8x8xf32>
    %123 = vector.shape_cast %122 : vector<1x8x8xf32> to vector<8x8xf32>
    %124 = vector.shape_cast %121 : vector<8x8xf32> to vector<1x8x8xf32>
    tpu.vector_store %arg17[%c2_75, %c0_76, %c0_77], %124 {strides = array<i32>} : memref<4x8x8xf32, #tpu.memory_space<vmem>>, vector<1x8x8xf32>,
    %c2_78 = arith.constant 2 : index
    %c0_79 = arith.constant 0 : index
    %c0_80 = arith.constant 0 : index
    %125 = vector.load %arg15[%c2_78, %c0_79, %c0_80] : memref<4x8x1xf32, #tpu.memory_space<vmem>>, vector<1x8x1xf32>
    %126 = vector.shape_cast %125 : vector<1x8x1xf32> to vector<8x1xf32>
    %127 = vector.shape_cast %100 : vector<8x1xf32> to vector<1x8x1xf32>
    tpu.vector_store %arg15[%c2_78, %c0_79, %c0_80], %127 {strides = array<i32>} : memref<4x8x1xf32, #tpu.memory_space<vmem>>, vector<1x8x1xf32>,
    %128 = vector.extract_strided_slice %19 {offsets = [0, 24], sizes = [8, 8], strides = [1, 1]} : vector<8x32xbf16> to vector<8x8xbf16>
    %129 = vector.extract_strided_slice %10 {offsets = [0, 24], sizes = [8, 8], strides = [1, 1]} : vector<8x32xbf16> to vector<8x8xbf16>
    %130 = vector.extract_strided_slice %18 {offsets = [0, 24], sizes = [8, 8], strides = [1, 1]} : vector<8x32xbf16> to vector<8x8xbf16>
    %cst_81 = arith.constant dense<0.000000e+00> : vector<8x8xf32>
    %131 = tpu.matmul %128, %129, %cst_81 {dimension_numbers = #tpu.dot_dimension_numbers<[1], [1], [0], [0], [0, 0, 1, 0], [], []>} : vector<8x8xbf16>, vector<8x8xbf16>, vector<8x8xf32> -> vector<8x8xf32>
    %c3 = arith.constant 3 : index
    %c0_82 = arith.constant 0 : index
    %c0_83 = arith.constant 0 : index
    %132 = vector.load %arg15[%c3, %c0_82, %c0_83] : memref<4x8x1xf32, #tpu.memory_space<vmem>>, vector<1x8x1xf32>
    %133 = vector.shape_cast %132 : vector<1x8x1xf32> to vector<8x1xf32>
    %cst_84 = arith.constant dense<0xFF800000> : vector<8xf32>
    %134 = vector.multi_reduction <maximumf>, %131, %cst_84 [1] : vector<8x8xf32> to vector<8xf32>
    %135 = vector.shape_cast %134 : vector<8xf32> to vector<8x1xf32>
    %136 = arith.maximumf %133, %135 : vector<8x1xf32>
    %137 = arith.subf %133, %136 : vector<8x1xf32>
    %138 = math.exp %137 : vector<8x1xf32>
    %139 = vector.broadcast %136 : vector<8x1xf32> to vector<8x8xf32>
    %140 = arith.subf %131, %139 : vector<8x8xf32>
    %141 = math.exp %140 : vector<8x8xf32>
    %c3_85 = arith.constant 3 : index
    %c0_86 = arith.constant 0 : index
    %c0_87 = arith.constant 0 : index
    %142 = vector.load %arg16[%c3_85, %c0_86, %c0_87] : memref<4x8x1xf32, #tpu.memory_space<vmem>>, vector<1x8x1xf32>
    %143 = vector.shape_cast %142 : vector<1x8x1xf32> to vector<8x1xf32>
    %144 = arith.mulf %138, %143 : vector<8x1xf32>
    %cst_88 = arith.constant dense<0.000000e+00> : vector<8xf32>
    %145 = vector.multi_reduction <add>, %141, %cst_88 [1] : vector<8x8xf32> to vector<8xf32>
    %146 = vector.shape_cast %145 : vector<8xf32> to vector<8x1xf32>
    %147 = arith.addf %144, %146 : vector<8x1xf32>
    %c3_89 = arith.constant 3 : index
    %c0_90 = arith.constant 0 : index
    %c0_91 = arith.constant 0 : index
    %148 = vector.load %arg16[%c3_89, %c0_90, %c0_91] : memref<4x8x1xf32, #tpu.memory_space<vmem>>, vector<1x8x1xf32>
    %149 = vector.shape_cast %148 : vector<1x8x1xf32> to vector<8x1xf32>
    %150 = vector.shape_cast %147 : vector<8x1xf32> to vector<1x8x1xf32>
    tpu.vector_store %arg16[%c3_89, %c0_90, %c0_91], %150 {strides = array<i32>} : memref<4x8x1xf32, #tpu.memory_space<vmem>>, vector<1x8x1xf32>,
    %c3_92 = arith.constant 3 : index
    %c0_93 = arith.constant 0 : index
    %c0_94 = arith.constant 0 : index
    %151 = vector.load %arg17[%c3_92, %c0_93, %c0_94] : memref<4x8x8xf32, #tpu.memory_space<vmem>>, vector<1x8x8xf32>
    %152 = vector.shape_cast %151 : vector<1x8x8xf32> to vector<8x8xf32>
    %153 = vector.broadcast %138 : vector<8x1xf32> to vector<8x8xf32>
    %154 = arith.mulf %153, %152 : vector<8x8xf32>
    %155 = arith.truncf %141 : vector<8x8xf32> to vector<8x8xbf16>
    %cst_95 = arith.constant dense<0.000000e+00> : vector<8x8xf32>
    %156 = tpu.matmul %155, %130, %cst_95 {dimension_numbers = #tpu.dot_dimension_numbers<[1], [0], [0], [1], [0, 0, 1, 1], [], []>} : vector<8x8xbf16>, vector<8x8xbf16>, vector<8x8xf32> -> vector<8x8xf32>
    %157 = arith.addf %154, %156 : vector<8x8xf32>
    %c3_96 = arith.constant 3 : index
    %c0_97 = arith.constant 0 : index
    %c0_98 = arith.constant 0 : index
    %158 = vector.load %arg17[%c3_96, %c0_97, %c0_98] : memref<4x8x8xf32, #tpu.memory_space<vmem>>, vector<1x8x8xf32>
    %159 = vector.shape_cast %158 : vector<1x8x8xf32> to vector<8x8xf32>
    %160 = vector.shape_cast %157 : vector<8x8xf32> to vector<1x8x8xf32>
    tpu.vector_store %arg17[%c3_96, %c0_97, %c0_98], %160 {strides = array<i32>} : memref<4x8x8xf32, #tpu.memory_space<vmem>>, vector<1x8x8xf32>,
    %c3_99 = arith.constant 3 : index
    %c0_100 = arith.constant 0 : index
    %c0_101 = arith.constant 0 : index
    %161 = vector.load %arg15[%c3_99, %c0_100, %c0_101] : memref<4x8x1xf32, #tpu.memory_space<vmem>>, vector<1x8x1xf32>
    %162 = vector.shape_cast %161 : vector<1x8x1xf32> to vector<8x1xf32>
    %163 = vector.shape_cast %136 : vector<8x1xf32> to vector<1x8x1xf32>
    tpu.vector_store %arg15[%c3_99, %c0_100, %c0_101], %163 {strides = array<i32>} : memref<4x8x1xf32, #tpu.memory_space<vmem>>, vector<1x8x1xf32>,
    %c0_i32_102 = arith.constant 0 : i32
    %164 = arith.cmpi eq, %arg3, %c0_i32_102 : i32
    %165 = arith.extui %164 : i1 to i32
    %c0_i32_103 = arith.constant 0 : i32
    %166 = arith.cmpi ne, %165, %c0_i32_103 : i32
    scf.if %166 {
      %c0_104 = arith.constant 0 : index
      %c0_105 = arith.constant 0 : index
      %c0_106 = arith.constant 0 : index
      %167 = vector.load %arg16[%c0_104, %c0_105, %c0_106] : memref<4x8x1xf32, #tpu.memory_space<vmem>>, vector<1x8x1xf32>
      %168 = vector.shape_cast %167 : vector<1x8x1xf32> to vector<8x1xf32>
      %169 = tpu.reciprocal %168 {approx = true} : vector<8x1xf32> -> vector<8x1xf32>
      %c0_107 = arith.constant 0 : index
      %c0_108 = arith.constant 0 : index
      %c0_109 = arith.constant 0 : index
      %170 = vector.load %arg17[%c0_107, %c0_108, %c0_109] : memref<4x8x8xf32, #tpu.memory_space<vmem>>, vector<1x8x8xf32>
      %171 = vector.shape_cast %170 : vector<1x8x8xf32> to vector<8x8xf32>
      %172 = vector.broadcast %169 : vector<8x1xf32> to vector<8x8xf32>
      %173 = arith.mulf %171, %172 : vector<8x8xf32>
      %c1_110 = arith.constant 1 : index
      %c0_111 = arith.constant 0 : index
      %c0_112 = arith.constant 0 : index
      %174 = vector.load %arg16[%c1_110, %c0_111, %c0_112] : memref<4x8x1xf32, #tpu.memory_space<vmem>>, vector<1x8x1xf32>
      %175 = vector.shape_cast %174 : vector<1x8x1xf32> to vector<8x1xf32>
      %176 = tpu.reciprocal %175 {approx = true} : vector<8x1xf32> -> vector<8x1xf32>
      %c1_113 = arith.constant 1 : index
      %c0_114 = arith.constant 0 : index
      %c0_115 = arith.constant 0 : index
      %177 = vector.load %arg17[%c1_113, %c0_114, %c0_115] : memref<4x8x8xf32, #tpu.memory_space<vmem>>, vector<1x8x8xf32>
      %178 = vector.shape_cast %177 : vector<1x8x8xf32> to vector<8x8xf32>
      %179 = vector.broadcast %176 : vector<8x1xf32> to vector<8x8xf32>
      %180 = arith.mulf %178, %179 : vector<8x8xf32>
      %c2_116 = arith.constant 2 : index
      %c0_117 = arith.constant 0 : index
      %c0_118 = arith.constant 0 : index
      %181 = vector.load %arg16[%c2_116, %c0_117, %c0_118] : memref<4x8x1xf32, #tpu.memory_space<vmem>>, vector<1x8x1xf32>
      %182 = vector.shape_cast %181 : vector<1x8x1xf32> to vector<8x1xf32>
      %183 = tpu.reciprocal %182 {approx = true} : vector<8x1xf32> -> vector<8x1xf32>
      %c2_119 = arith.constant 2 : index
      %c0_120 = arith.constant 0 : index
      %c0_121 = arith.constant 0 : index
      %184 = vector.load %arg17[%c2_119, %c0_120, %c0_121] : memref<4x8x8xf32, #tpu.memory_space<vmem>>, vector<1x8x8xf32>
      %185 = vector.shape_cast %184 : vector<1x8x8xf32> to vector<8x8xf32>
      %186 = vector.broadcast %183 : vector<8x1xf32> to vector<8x8xf32>
      %187 = arith.mulf %185, %186 : vector<8x8xf32>
      %c3_122 = arith.constant 3 : index
      %c0_123 = arith.constant 0 : index
      %c0_124 = arith.constant 0 : index
      %188 = vector.load %arg16[%c3_122, %c0_123, %c0_124] : memref<4x8x1xf32, #tpu.memory_space<vmem>>, vector<1x8x1xf32>
      %189 = vector.shape_cast %188 : vector<1x8x1xf32> to vector<8x1xf32>
      %190 = tpu.reciprocal %189 {approx = true} : vector<8x1xf32> -> vector<8x1xf32>
      %c3_125 = arith.constant 3 : index
      %c0_126 = arith.constant 0 : index
      %c0_127 = arith.constant 0 : index
      %191 = vector.load %arg17[%c3_125, %c0_126, %c0_127] : memref<4x8x8xf32, #tpu.memory_space<vmem>>, vector<1x8x8xf32>
      %192 = vector.shape_cast %191 : vector<1x8x8xf32> to vector<8x8xf32>
      %193 = vector.broadcast %190 : vector<8x1xf32> to vector<8x8xf32>
      %194 = arith.mulf %192, %193 : vector<8x8xf32>
      %195 = tpu.concatenate %173, %180, %187, %194 in 1 : vector<8x8xf32>, vector<8x8xf32>, vector<8x8xf32>, vector<8x8xf32> -> vector<8x32xf32>
      %c0_128 = arith.constant 0 : index
      %c0_129 = arith.constant 0 : index
      %c0_130 = arith.constant 0 : index
      %196 = vector.load %arg13[%c0_128, %c0_129, %c0_130] : memref<1x8x32xf32, #tpu.memory_space<vmem>>, vector<1x8x32xf32>
      %197 = vector.shape_cast %196 : vector<1x8x32xf32> to vector<8x32xf32>
      %198 = vector.shape_cast %195 : vector<8x32xf32> to vector<1x8x32xf32>
      tpu.vector_store %arg13[%c0_128, %c0_129, %c0_130], %198 {strides = array<i32>} : memref<1x8x32xf32, #tpu.memory_space<vmem>>, vector<1x8x32xf32>,
    } else {
    }
    return
  }
  func.func @transform_0(%arg0: i32, %arg1: i32, %arg2: i32, %arg3: i32) -> (i32, i32, i32) {
    %c0_i32 = arith.constant 0 : i32
    %c0_i32_0 = arith.constant 0 : i32
    return %arg0, %arg2, %c0_i32 : i32, i32, i32
  }
  func.func @transform_1(%arg0: i32, %arg1: i32, %arg2: i32, %arg3: i32) -> (i32, i32, i32) {
    %c0_i32 = arith.constant 0 : i32
    %c0_i32_0 = arith.constant 0 : i32
    return %arg0, %arg3, %c0_i32 : i32, i32, i32
  }
  func.func @transform_2(%arg0: i32, %arg1: i32, %arg2: i32, %arg3: i32) -> (i32, i32, i32) {
    %c0_i32 = arith.constant 0 : i32
    %c0_i32_0 = arith.constant 0 : i32
    return %arg0, %arg3, %c0_i32 : i32, i32, i32
  }
  func.func @transform_3(%arg0: i32, %arg1: i32, %arg2: i32, %arg3: i32) -> (i32, i32) {
    %c0_i32 = arith.constant 0 : i32
    %c0_i32_0 = arith.constant 0 : i32
    return %c0_i32, %arg1 : i32, i32
  }
  func.func @transform_4(%arg0: i32, %arg1: i32, %arg2: i32, %arg3: i32) -> (i32, i32) {
    %c0_i32 = arith.constant 0 : i32
    %c0_i32_0 = arith.constant 0 : i32
    return %c0_i32, %arg1 : i32, i32
  }
  func.func @transform_5(%arg0: i32, %arg1: i32, %arg2: i32, %arg3: i32) -> (i32, i32) {
    %c0_i32 = arith.constant 0 : i32
    %c0_i32_0 = arith.constant 0 : i32
    return %c0_i32, %arg1 : i32, i32
  }
  func.func @transform_6(%arg0: i32, %arg1: i32, %arg2: i32, %arg3: i32) -> (i32, i32) {
    %c0_i32 = arith.constant 0 : i32
    %c0_i32_0 = arith.constant 0 : i32
    return %c0_i32, %arg1 : i32, i32
  }
  func.func @transform_7(%arg0: i32, %arg1: i32, %arg2: i32, %arg3: i32) -> (i32, i32) {
    %c0_i32 = arith.constant 0 : i32
    %c0_i32_0 = arith.constant 0 : i32
    return %c0_i32, %arg1 : i32, i32
  }
  func.func @transform_8(%arg0: i32, %arg1: i32, %arg2: i32, %arg3: i32) -> (i32, i32) {
    %c0_i32 = arith.constant 0 : i32
    %c0_i32_0 = arith.constant 0 : i32
    return %c0_i32, %arg1 : i32, i32
  }
  func.func @transform_9(%arg0: i32, %arg1: i32, %arg2: i32, %arg3: i32) -> (i32, i32, i32) {
    %c0_i32 = arith.constant 0 : i32
    return %arg0, %arg2, %arg1 : i32, i32, i32
  }
}

</mosaic_0001>

<bundles_post_ra>
// kernel: tpu_custom_call.1
= control target key start
LH: loop header
LB: loop body
LE: loop exit
PB: predicated region body
PF: predicated region fallthrough
CT: control target
= control target key end

     0   :  { %s2198_s0 = inlined_call_operand.hbm [shape: bf16[2,8,32], index: 0, kind: input, shape index: {}]   ;;  %s2199_s1 = inlined_call_operand.hbm [shape: bf16[2,8,32], index: 1, kind: input, shape index: {}]   ;;  %s2200_s2 = inlined_call_operand.hbm [shape: bf16[2,8,32], index: 2, kind: input, shape index: {}]   ;;  %s2201_s3 = inlined_call_operand.hbm [shape: bf16[32,32], index: 3, kind: input, shape index: {}]   ;;  %s2202_s4 = inlined_call_operand.vmem [shape: f32[1,32], index: 4, kind: input, shape index: {}]   ;;  %s2203_s5 = inlined_call_operand.hbm [shape: bf16[32,32], index: 5, kind: input, shape index: {}]   ;;  %s2204_s6 = inlined_call_operand.vmem [shape: f32[1,32], index: 6, kind: input, shape index: {}]   ;;  %s2205_s7 = inlined_call_operand.hbm [shape: bf16[32,32], index: 7, kind: input, shape index: {}]   ;;  %s2206_s8 = inlined_call_operand.vmem [shape: f32[1,32], index: 8, kind: input, shape index: {}]   ;;  %s2207_s9 = inlined_call_operand.hbm [shape: f32[2,8,32], index: 9, kind: output, shape index: {}]  }
   0x1   :  { %2222 = sst [smem:[#allocation31_spill]] %s2199_s1 }
   0x2   :  { %2223 = sst [smem:[#allocation32_spill]] %s2201_s3 }
   0x3   :  { %2224 = sst [smem:[#allocation33_spill]] %s2203_s5 }
   0x4   :  { %2225 = sst [smem:[#allocation34_spill]] %s2205_s7 }
   0x5   :  { %2226 = sst [smem:[#allocation35_spill]] %s2207_s9 }
   0x6   :  { %14 = vsyncpa [#allocation7], 0 }
   0x7   :  { %16 = vsyncpa [#allocation7 + $0x1], 0 }
   0x8   :  { %17 = vsyncpa [#allocation10], 0 }
   0x9   :  { %19 = vsyncpa [#allocation10 + $0x1], 0 }
   0xa   :  { %20 = vsyncpa [#allocation13], 0 }
   0xb   :  { %21 = vsyncpa [#allocation16], 0 }
   0xc   :  { %22 = vsyncpa [#allocation8], 0 }
   0xd   :  { %24 = vsyncpa [#allocation8 + $0x1], 0  ;;  %s1874_s30 = smov 0   ;;  %s1876_s10 = smov 0  }
   0xe   :  { %s1878_s11 = smov 0   ;;  %s1880_s12 = smov 0  }
   0xf   :  { %s1882_s13 = smov 0   ;;  %s1884_s14 = smov 0  }
  0x10 LB: > { %2227 = sst [smem:[#allocation23_spill]] %s1788_s30  ;;  %s1905_s15 = sadd.s32 4294967295, %s1808_s14   ;;  %s1808_s14 = sphi %s1884_s14, %s30_s14   ;;  %s1804_s13 = sphi %s1882_s13, %s2257_s13   ;;  %s1800_s12 = sphi %s1880_s12, %s2256_s12   ;;  %s1796_s11 = sphi %s1878_s11, %s2260_s11   ;;  %s1792_s10 = sphi %s1876_s10, %s2259_s10   ;;  %s1788_s30 = sphi %s1874_s30, %s2258_s30  }
  0x11   : > { %2228 = sst [smem:[#allocation24_spill]] %s1800_s12  ;;  %p1323_p0 = scmp.ge.s32.totalorder %s1808_s14, 1 }
  0x12   : > { %2229 = sst [smem:[#allocation25_spill]] %s1804_s13  ;;  %p79_p1 = scmp.eq.s32.totalorder %s1905_s15, 0 }
  0x13   : > { %2230 = sst [smem:[#allocation26_spill]] %s1808_s14  ;;  %p331_p2 = scmp.lt.s32.totalorder %s1808_s14, 3 }
  0x14   : > { %s2231_s3 = sld [smem:[#allocation32_spill]]  ;;  %s1810_s20 = smov [#allocation12]  }
  0x15   : > { %p1913_p3 = pnand %p1323_p0, %p331_p2  ;;  %s346_s21 = sshll.u32 %s1810_s20, 4  ;;  %s347_s21 = int_to_ptr.vmem [resolvable:$true] %s346_s21 }
  0x16   : > { %p1330_p6 = scmp.ge.s32.totalorder %s1808_s14, 2  ;;  %s2208_s23 = smov 64  }
  0x17   : > { %p1410_p4 = pneg %p1913_p3  ;;  %s2210_s24 = smov 4  }
  0x18   : > { %s1322_s25 = sadd.s32 4294967294, %s1808_s14   ;;  %s56_s26 = sadd.s32 1, %s1804_s13 }
  0x19   : > { %p1921_p5 = pnand %p1410_p4, %p79_p1  ;;  %s65_s27 = sadd.s32 1, %s1796_s11 }
  0x1a   : > { %s344_s18 = sshll.u32 %s2231_s3, 4  ;;  %p58_p7 = scmp.ge.s32.totalorder %s56_s26, 2  ;;  %s345_s18 = int_to_ptr.hbm [resolvable:$true] %s344_s18 }
  0x1b   : > { %1413 = dma.hbm_to_vmem [thread:$0]  (!%p1921_p5), %s345_s18, 256, %s347_s21, [#allocation13], %s2208_s23, %s2208_s23, %s2210_s24  }
  0x1c   : > { %p72_p8 = scmp.ne.s32.totalorder %s1796_s11, %s1792_s10  ;;  %p73_p9 = scmp.eq.s32.totalorder %s1808_s14, 0 }
  0x1d   : > { %p78_p10 = scmp.ne.s32.totalorder %s1792_s10, %s1788_s30  ;;  %s2262_s26 = smov (%p58_p7, %s56_s26), 0 }
  0x1e   : > { %2234 = sst [smem:[#allocation27_spill]] %s2262_s26  ;;  %p1941_p11 = por %p73_p9, %p72_p8 }
  0x1f   : > { %p1947_p12 = por %p79_p1, %p78_p10  ;;  %s60_s16 = ssub.s32 %s1804_s13, %s2262_s26 }
  0x20   : > { %p318_p13 = scmp.eq.s32.totalorder %s1905_s15, 1  ;;  %p63_p0 = scmp.eq.s32.totalorder %s60_s16, 0 }
  0x21   : > { %p324_p2 = scmp.eq.s32.totalorder %s1322_s25, 1  ;;  %p1437_p7 = scmp.lt.s32.totalorder %s1808_s14, 2 }
  0x22   : > { %p1954_p4 = por %p318_p13, %p72_p8  ;;  %s2214_s21 = sand.u32 1, %s1796_s11  }
  0x23   : > { %s1960_s18 = scalar_select %p63_p0, %s1796_s11, %s65_s27  }
  0x24   : > { %s2237_s17 = scalar_select %p1954_p4, 1, 0 }
  0x25   : > { %2239 = sst [smem:[#allocation29_spill]] %s1960_s18  ;;  %p1962_p9 = por %p324_p2, %p78_p10 }
  0x26   : > { %2238 = sst [smem:[#allocation28_spill]] %s2237_s17  ;;  %s1969_s23 = sshll.u32 %s2214_s21, 2 }
  0x27   : > { %s2240_s20 = scalar_select %p1962_p9, 1, 0 }
  0x28   : > { %s1972_s24 = sshll.u32 %s1804_s13, 2  ;;  %p1976_p8 = pnand %p1437_p7, %p1941_p11 }
  0x29   : > { %2241 = sst [smem:[#allocation30_spill]] %s2240_s20  ;;  %s430_s27 = sand.u32 1, %s1808_s14  }
  0x2a   : > { %s2243_s1 = sld [smem:[#allocation31_spill]]  ;;  %s434_s20 = scalar_lea.vmem [#allocation9], %s1969_s23 }
  0x2b   : > { %s443_s21 = sshll.u32 %s434_s20, 4  ;;  %s1986_s28 = scalar_lea.sflag [#allocation10], %s430_s27  ;;  %s444_s21 = int_to_ptr.vmem [resolvable:$true] %s443_s21 }
  0x2c   : > { %s2244_s5 = sld [smem:[#allocation33_spill]]  ;;  %s1813_s3 = smov [#allocation14]  }
  0x2d   : > { %s2245_s7 = sld [smem:[#allocation34_spill]]  ;;  %s2246_s27 = smov 4  }
  0x2e   : > { %s2247_s17 = smov 64   ;;  %s1814_s30 = smov [#allocation15]  }
  0x2f   : > { %s390_s13 = sshll.u32 %s1814_s30, 4  ;;  %s414_s20 = scalar_lea.vmem [#allocation6], %s1969_s23  ;;  %s391_s13 = int_to_ptr.vmem [resolvable:$true] %s390_s13 }
  0x30   : > { %s439_s26 = scalar_lea.hbm %s2243_s1, %s1972_s24  ;;  %s423_s16 = sshll.u32 %s414_s20, 4  ;;  %s424_s16 = int_to_ptr.vmem [resolvable:$true] %s423_s16 }
  0x31   : > { %s441_s18 = sshll.u32 %s439_s26, 4  ;;  %s368_s26 = sshll.u32 %s1813_s3, 4  ;;  %s442_s18 = int_to_ptr.hbm [resolvable:$true] %s441_s18  ;;  %s369_s26 = int_to_ptr.vmem [resolvable:$true] %s368_s26 }
  0x32   : > { %1426 = dma.hbm_to_vmem [thread:$0]  (!%p1976_p8), %s442_s18, 64, %s444_s21, %s1986_s28  }
  0x33   : > { %s366_s14 = sshll.u32 %s2244_s5, 4  ;;  %s388_s1 = sshll.u32 %s2245_s7, 4  ;;  %s367_s14 = int_to_ptr.hbm [resolvable:$true] %s366_s14  ;;  %s389_s1 = int_to_ptr.hbm [resolvable:$true] %s388_s1 }
  0x34   : > { %1416 = dma.hbm_to_vmem [thread:$0]  (!%p1921_p5), %s367_s14, 256, %s369_s26, [#allocation13], %s2247_s17, %s2247_s17, %s2246_s27  }
  0x35   : > { %1419 = dma.hbm_to_vmem [thread:$0]  (!%p1921_p5), %s389_s1, 256, %s391_s13, [#allocation16], %s2247_s17, %s2247_s17, %s2246_s27  }
  0x36   : > { %s419_s3 = scalar_lea.hbm %s2198_s0, %s1972_s24  ;;  %s2248_s14 = sand.u32 1, %s1796_s11  }
  0x37   : > { %s421_s5 = sshll.u32 %s419_s3, 4  ;;  %s411_s26 = scalar_lea.sflag [#allocation7], %s2248_s14  ;;  %s422_s5 = int_to_ptr.hbm [resolvable:$true] %s421_s5 }
  0x38   : > { %1423 = dma.hbm_to_vmem [thread:$0]  (!%p1976_p8), %s422_s5, 64, %s424_s16, %s411_s26  }
  0x39   : > { %s459_s7 = scalar_lea.hbm %s2200_s2, %s1972_s24  ;;  %s454_s9 = scalar_lea.vmem [#allocation11], %s1969_s23 }
  0x3a   : > { %s463_s12 = sshll.u32 %s454_s9, 4  ;;  %s461_s1 = sshll.u32 %s459_s7, 4  ;;  %s464_s12 = int_to_ptr.vmem [resolvable:$true] %s463_s12  ;;  %s462_s1 = int_to_ptr.hbm [resolvable:$true] %s461_s1 }
  0x3b   : > { %1429 = dma.hbm_to_vmem [thread:$0]  (!%p1976_p8), %s462_s1, 64, %s464_s12, %s1986_s28  }
  0x3c   : > { %472 = sbr.rel (%p1913_p3) target bundleno = 1097 (0x449), region = 56  ;;  %s2027_s17 = sand.u32 (!%p1913_p3), 1, %s1792_s10  }
  0x3d   : > { %s2030_s5 = sshll.u32 (!%p1913_p3), %s2027_s17, 2  ;;  %s475_s24 = scalar_lea.sflag (!%p1913_p3), [#allocation7], %s2027_s17 }
  0x3e   : > { %s478_s23 = scalar_lea.vmem (!%p1913_p3), [#allocation6], %s2030_s5 }
  0x41   : > { %1767 = dma.done.wait (%p1947_p12), %s475_s24, 64  }
  0x42   : > { %1769 = vsyncadd (%p1947_p12), %s475_s24, 4294967232  ;;  %s484_s7 = sand.u32 1, %s1905_s15   ;;  %s488_s12 = scalar_lea.vmem [#allocation9], %s2030_s5 }
  0x43   : > { %s485_s9 = scalar_lea.sflag [#allocation10], %s484_s7 }
  0x44   : > { %1771 = dma.done.wait (%p1947_p12), %s485_s9, 128  }
  0x45   : > { %1773 = vsyncadd (%p1947_p12), %s485_s9, 4294967168  ;;  %s498_s19 = scalar_lea.vmem [#allocation11], %s2030_s5 }
  0x46   : > { %1775 = dma.done.wait (%p79_p1), [#allocation13], 512  }
  0x47   : > { %1777 = vsyncadd (%p79_p1), [#allocation13], 4294966784 }
  0x48   : > { %1779 = dma.done.wait (%p79_p1), [#allocation16], 256  }
  0x49   : > { %1781 = vsyncadd (%p79_p1), [#allocation16], 4294967040  ;;  %v1385_v0 = vld [vmem:[#allocation12 + $0x8] sm:$0xff]  ;;  %v1387_v1 = vld [vmem:[#allocation14 + $0x8] sm:$0xff]  ;;  %vm603_vm0 = vcmask 261120   ;;  %vm633_vm1 = vcmask 64512  }
  0x4a   : > { %v1384_v2 = vld [vmem:[#allocation12] sm:$0xff]  ;;  %613 = vmatpush.bf16.msra.mxu0 %v1385_v0  ;;  %669 = vmatpush.bf16.msra.mxu1 %v1387_v1  ;;  %v1386_v3 = vld [vmem:[#allocation14] sm:$0xff]  ;;  %v582_v4 = vld [vmem:[%s478_s23] sm:$0xf]  ;;  %vm622_vm2 = vcmask 257024   ;;  %s1815_s27 = smov 112  }
  0x4b   : > { %v638_v5 = vld [vmem:[%s488_s12] sm:$0xf]  ;;  %v1507_v6 = vld [vmem:[%s2202_s4] ss:$0 sm:$0xff]  ;;  %s1816_s13 = smov 120   ;;  %s1817_s18 = smov 104  }
  0x4c   : > { %v1508_v7 = vld [vmem:[%s2204_s6] ss:$0 sm:$0xff]  ;;  %v1389_v23 = vld [vmem:[#allocation15 + $0x8] sm:$0xff]  ;;  %v677_v29 = vld [vmem:[%s498_s19] sm:$0xf]  ;;  %vm624_vm3 = vcmask 7168  }
  0x4d   : > { %707 = vmatpush.bf16.msra.mxu2 %v1389_v23  ;;  %v1388_v28 = vld [vmem:[#allocation15] sm:$0xff]  ;;  %v1818_v38 = vmov -inf   ;;  %v1819_v39 = vmov 0   ;;  %v1820_v40 = vmov 0.0   ;;  %vm771_vm4 = vcmask 1043456   ;;  %s2249_s20 = sld [smem:[#allocation24_spill]] }
  0x4e   : > { %614 = vmatpush.bf16.msra.mxu0 %v1384_v2  ;;  %670 = vmatpush.bf16.msra.mxu1 %v1386_v3  ;;  %625 = vst.msk [vmem:[#allocation3] sm:$0xff] %vm624_vm3, %v1818_v38  ;;  %v1509_v55 = vld [vmem:[%s2206_s8] ss:$0 sm:$0xff]  ;;  %s1821_s16 = smov 16   ;;  %s1822_s14 = smov 8   ;;  %vm1095_vm5 = vcmask 130048  }
  0x4f   : > { %626 = vst.msk [vmem:[#allocation3 + $0x8] sm:$0xff] %vm624_vm3, %v1818_v38  ;;  %1505 = vset.pattern.permute.xlu1 %v1819_v39  ;;  %1504 = vset.pattern.permute.xlu0 %v1819_v39  ;;  %s1823_s26 = smov 24   ;;  %s1344_s22 = sshll.u32 %s2027_s17, 3  ;;  %vm1097_vm6 = vcmask 195584  }
  0x50   : > { %627 = vst.msk [vmem:[#allocation3 + $0x10] sm:$0xff] %vm624_vm3, %v1818_v38  ;;  %1506 = vset.pattern.permute.xlu2 %v1819_v39  ;;  %s2250_s24 = sld [smem:[#allocation35_spill]]  ;;  %s567_s7 = scalar_lea.vmem [#allocation17], %s1344_s22 }
  0x51   : > { %1353 = vmatmul.msk.bf16.vlgmr.msra.gmra.mxu0 %vm603_vm0, %v582_v4  ;;  %1362 = vmatmul.msk.bf16.vlgmr.msra.gmra.mxu1 %vm603_vm0, %v638_v5  ;;  %628 = vst.msk [vmem:[#allocation3 + $0x18] sm:$0xff] %vm624_vm3, %v1818_v38  ;;  %s1115_s12 = sshll.u32 %s567_s7, 4  ;;  %s1101_s29 = scalar_lea.sflag [#allocation8], %s2027_s17  ;;  %s1116_s12 = int_to_ptr.vmem [resolvable:$true] %s1115_s12 }
  0x52   : > { %708 = vmatpush.bf16.msra.mxu2 %v1388_v28  ;;  %634 = vst.msk [vmem:[#allocation5] sm:$0xff] %vm633_vm1, %v1820_v40 }
  0x53   : > { %629 = vst.msk [vmem:[#allocation4] sm:$0xff] %vm624_vm3, %v1820_v40  ;;  %s1381_s30 = sshll.u32 %s2249_s20, 3 }
  0x54   : > { %630 = vst.msk [vmem:[#allocation4 + $0x8] sm:$0xff] %vm624_vm3, %v1820_v40 }
  0x55   : > { %1371 = vmatmul.msk.bf16.vlgmr.msra.gmra.mxu2 %vm603_vm0, %v677_v29  ;;  %631 = vst.msk [vmem:[#allocation4 + $0x10] sm:$0xff] %vm624_vm3, %v1820_v40  ;;  %v736_v43 = vld [vmem:[#allocation3] sm:$0xff] }
  0x56   : > { %632 = vst.msk [vmem:[#allocation4 + $0x18] sm:$0xff] %vm624_vm3, %v1820_v40  ;;  %v821_v62 = vld [vmem:[#allocation3 + $0x8] sm:$0xff]  ;;  %s1113_s23 = scalar_lea.hbm %s2250_s24, %s1381_s30 }
  0x57   : > { %635 = vst.msk [vmem:[#allocation5 + $0x8] sm:$0xff] %vm633_vm1, %v1820_v40  ;;  %v2112_v1 = vld [vmem:[#allocation3 + $0x10] sm:$0xff]  ;;  %s1117_s19 = sshll.u32 %s1113_s23, 4  ;;  %s1118_s19 = int_to_ptr.hbm [resolvable:$true] %s1117_s19 }
  0x58   : > { %636 = vst.msk [vmem:[#allocation5 + $0x10] sm:$0xff] %vm633_vm1, %v1820_v40  ;;  %s1728_s25 = sshra.s32 %s1118_s19, 4  ;;  %s1729_s25 = int_to_ptr.hbm [resolvable:$true] %s1728_s25 }
  0x59   : > { %637 = vst.msk [vmem:[#allocation5 + $0x18] sm:$0xff] %vm633_vm1, %v1820_v40  ;;  %s1730_s15 = scalar_lea.hbm %s1729_s25, 8  ;;  %p1735_p10 = scmp.lt.s32.totalorder %s1729_s25, %s2250_s24 }
  0x5a   : > { %p1731_p1 = scmp.ne.s32.totalorder %s1729_s25, %s1730_s15 }
  0x5c   : > { %p1732_p3 = pnand %p1731_p1, %p1954_p4 }
  0x5e   : > { %p1733_p5 = pneg %p1732_p3 }
  0xce   : > { %v616_v8 = vpop.f32.mrf.mxu0  ;;  %v672_v9 = vpop.f32.mrf.mxu1 }
  0xcf   : > { %v617_v10 = vadd.f32 %v1507_v6, %v616_v8  ;;  %v673_v11 = vadd.f32 %v1508_v7, %v672_v9  ;;  %v2119_v8 = vld [vmem:[#allocation3 + $0x18] sm:$0xff] }
  0xd1   : > { %v620_v12 = vmul.f32 0.35355338, %v617_v10  ;;  %v676_v13 = vpack.c.bf16 %v673_v11, %v673_v11 }
  0xd3   : > { %v621_v14 = vpack.c.bf16 %v620_v12, %v620_v12  ;;  %v797_v15 = vunpack.c.l.b16 %v676_v13  ;;  %v721_v16 = vsel %vm633_vm1, %v676_v13, 0 }
  0xd4   : > { %730 = vmatpush.bf16.xpose.msra.mxu3 %v721_v16 }
  0xd5   : > { %623 = vst.msk [vmem:[#allocation2] sm:$0xf] %vm622_vm2, %v621_v14  ;;  %v798_v17 = vpack.c.b16 %v797_v15, %v797_v15 }
  0xd6   : > { %v618_v18 = vpop.f32.mrf.mxu0  ;;  %v674_v19 = vpop.f32.mrf.mxu1 }
  0xd7   : > { %883 = vrot.lane.b32.xlu1 %v798_v17, %s1815_s27  ;;  %799 = vrot.lane.b32.xlu0 %v798_v17, %s1816_s13 }
  0xd8   : > { %v710_v44 = vpop.f32.mrf.mxu2 }
  0xd9   : > { %v711_v57 = vadd.f32 %v1509_v55, %v710_v44 }
  0xdb   : > { %v714_v58 = vpack.c.bf16 %v711_v57, %v711_v57 }
  0xdc   : > { %v715_v20 = vld [vmem:[#allocation2] sm:$0xf] }
  0xdd   : > { %1372 = vmatmul.msk.bf16.vlgmr.msra.gmra.mxu3 %vm633_vm1, %v715_v20  ;;  %v792_v21 = vunpack.c.l.b16 %v715_v20  ;;  %v855_v59 = vunpack.c.l.b16 %v714_v58  ;;  %v773_v61 = vsel %vm771_vm4, %v714_v58, 0 }
  0xde   : > { %782 = vmatpush.bf16.msrb.mxu0 %v773_v61  ;;  %v922_v61 = vld [vmem:[#allocation4 + $0x10] sm:$0xff] }
  0xdf   : > { %v793_v22 = vpack.c.b16 %v792_v21, %v792_v21  ;;  %964 = vrot.lane.b32.xlu1 %v798_v17, %s1817_s18  ;;  %v856_v60 = vpack.c.b16 %v855_v59, %v855_v59 }
  0xe0   : > { %v712_v51 = vpop.f32.mrf.mxu2 }
  0xe1   : > { %881 = vrot.lane.b32.xlu2 %v793_v22, %s1815_s27  ;;  %794 = vrot.lane.b32.xlu0 %v793_v22, %s1816_s13 }
  0xe9   : > { %962 = vrot.lane.b32.xlu2 %v793_v22, %s1817_s18 }
 0x13b   : > { %v882_v30 = vpop.permute.xlu2 %881 }
 0x143   : > { %v963_v36 = vpop.permute.xlu2 %962 }
 0x149   : > { %v884_v24 = vpop.permute.xlu1 %883  ;;  %v800_v25 = vpop.permute.xlu0 %799 }
 0x14a   : > { %v805_v26 = vsel %vm633_vm1, %v800_v25, 0  ;;  %v889_v27 = vsel %vm633_vm1, %v884_v24, 0 }
 0x14b   : > { %814 = vmatpush.bf16.xpose.msrb.mxu1 %v805_v26  ;;  %898 = vmatpush.bf16.xpose.msrb.mxu3 %v889_v27 }
 0x151   : > { %v965_v31 = vpop.permute.xlu1 %964 }
 0x152   : > { %v970_v32 = vsel %vm633_vm1, %v965_v31, 0  ;;  %1376 = vmatmul.msk.bf16.vlgmr.msrb.gmra.mxu3 %vm633_vm1, %v882_v30 }
 0x153   : > { %979 = vmatpush.bf16.xpose.msra.mxu1 %v970_v32  ;;  %v795_v33 = vpop.permute.xlu0 %794 }
 0x154   : > { %1374 = vmatmul.msk.bf16.vlgmr.msrb.gmra.mxu1 %vm633_vm1, %v795_v33 }
 0x160   : > { %v2077_v34 = vpop.f32.mrf.mxu3 }
 0x161   : > { %v737_v35 = vsel %vm633_vm1, %v2077_v34, -inf }
 0x162   : > { %738 = vmax.xlane.f32.xlu1 %v737_v35 }
 0x164   : > { %1378 = vmatmul.msk.bf16.vlgmr.msra.gmra.mxu1 %vm633_vm1, %v963_v36 }
 0x168   : > { %v734_v37 = vpop.f32.mrf.mxu3 }
 0x1d1   : > { %v2094_v41 = vpop.f32.mrf.mxu1 }
 0x1d2   : > { %v822_v42 = vsel %vm633_vm1, %v2094_v41, -inf }
 0x1d3   : > { %823 = vmax.xlane.f32.xlu0 %v822_v42 }
 0x1d5   : > { %v739_v45 = vpop.xlane.xlu1 %738  ;;  %v2098_v46 = vpop.f32.mrf.mxu3 }
 0x1d6   : > { %v740_v47 = vmax.f32 %v736_v43, %v739_v45  ;;  %v906_v48 = vsel %vm633_vm1, %v2098_v46, -inf }
 0x1d7   : > { %907 = vmax.xlane.f32.xlu2 %v906_v48 }
 0x1d8   : > { %v741_v49 = vsub.f32 %v736_v43, %v740_v47  ;;  %790 = vst.msk [vmem:[#allocation3] sm:$0xff] %vm624_vm3, %v740_v47  ;;  %746 = vperm.xlu1 %1505, %v740_v47  }
 0x1d9   : > { %v818_v50 = vpop.f32.mrf.mxu1 }
 0x1da   : > { %v742_v14 = vmul.f32 1.442695, %v741_v49 }
 0x1dd   : > { %v902_v52 = vpop.f32.mrf.mxu3 }
 0x1e1   : > { %v2103_v53 = vpop.f32.mrf.mxu1 }
 0x1e2   : > { %v987_v54 = vsel %vm633_vm1, %v2103_v53, -inf }
 0x1e3   : > { %988 = vmax.xlane.f32.xlu2 %v987_v54 }
 0x1e9   : > { %v983_v56 = vpop.f32.mrf.mxu1 }
 0x1fb   : > { %857 = vrot.lane.b32.xlu2 %v856_v60, %s1816_s13  ;;  %s1734_s13 = scalar_lea.hbm %s2250_s24, 16 }
 0x1fc   : > { %p1736_p11 = scmp.lt.s32.totalorder %s1734_s13, %s1730_s15 }
 0x1fe   : > { %p1737_p12 = por %p1736_p11, %p1735_p10 }
 0x200   : > { %p1738_p13 = pnand %p1737_p12, %p1733_p5 }
 0x246   : > { %v824_v63 = vpop.xlane.xlu0 %823 }
 0x247   : > { %v825_v0 = vmax.f32 %v821_v62, %v824_v63 }
 0x249   : > { %880 = vst.msk [vmem:[#allocation3 + $0x8] sm:$0xff] %vm624_vm3, %v825_v0  ;;  %831 = vperm.xlu0 %1504, %v825_v0   ;;  %v826_v15 = vsub.f32 %v821_v62, %v825_v0 }
 0x24a   : > { %v747_v2 = vpop.permute.xlu1 %746  ;;  %v908_v3 = vpop.xlane.xlu2 %907 }
 0x24b   : > { %v749_v4 = vsub.f32 %v2077_v34, %v747_v2  ;;  %v909_v5 = vmax.f32 %v2112_v1, %v908_v3  ;;  %v827_v16 = vmul.f32 1.442695, %v826_v15  ;;  %v838_v3 = vld [vmem:[#allocation4 + $0x8] sm:$0xff] }
 0x24c   : > { %v846_v15 = vld [vmem:[#allocation5 + $0x8] sm:$0xff] }
 0x24d   : > { %v750_v6 = vmul.f32 1.442695, %v749_v4  ;;  %v910_v7 = vsub.f32 %v2112_v1, %v909_v5  ;;  %961 = vst.msk [vmem:[#allocation3 + $0x10] sm:$0xff] %vm624_vm3, %v909_v5  ;;  %915 = vperm.xlu2 %1506, %v909_v5  }
 0x24f   : > { %1510 = vpow2.f32 %v750_v6  ;;  %v911_v42 = vmul.f32 1.442695, %v910_v7 }
 0x250   : > { %1512 = vpow2.f32 %v742_v14  ;;  %v1003_v14 = vld [vmem:[#allocation4 + $0x18] sm:$0xff] }
 0x251   : > { %1514 = vpow2.f32 %v827_v16 }
 0x255   : > { %v1511_v9 = vpop.eup %1510  ;;  %938 = vrot.lane.b32.xlu2 %v856_v60, %s1815_s27 }
 0x256   : > { %v989_v10 = vpop.xlane.xlu2 %988  ;;  %v767_v11 = vpack.c.bf16 %v1511_v9, %v1511_v9  ;;  %v1513_v17 = vpop.eup %1512  ;;  %v754_v19 = vsel %vm633_vm1, %v1511_v9, 0.0  ;;  %v930_v9 = vld [vmem:[#allocation5 + $0x10] sm:$0xff] }
 0x257   : > { %v2123_v12 = vmax.f32 %v2119_v8, %v989_v10  ;;  %v2132_v18 = vpop.eup %1514 }
 0x258   : > { %1373 = vmatmul.msk.bf16.vlgmr.msrb.gmra.mxu0 %vm633_vm1, %v767_v11  ;;  %v839_v6 = vmul.f32 %v2132_v18, %v838_v3 }
 0x259   : > { %v991_v13 = vsub.f32 %v2119_v8, %v2123_v12  ;;  %1042 = vst.msk [vmem:[#allocation3 + $0x18] sm:$0xff] %vm624_vm3, %v2123_v12  ;;  %996 = vperm.xlu1 %1505, %v2123_v12  }
 0x25b   : > { %v992_v52 = vmul.f32 1.442695, %v991_v13 }
 0x25e   : > { %v858_v20 = vpop.permute.xlu2 %857 }
 0x25f   : > { %v863_v21 = vsel %vm771_vm4, %v858_v20, 0 }
 0x260   : > { %872 = vmatpush.bf16.msrb.mxu2 %v863_v21 }
 0x261   : > { %1019 = vrot.lane.b32.xlu1 %v856_v60, %s1817_s18 }
 0x269   : > { %763 = vperm.xlu1 %1505, %v1513_v17  }
 0x271   : > { %849 = vperm.xlu1 %1505, %v2132_v18  }
 0x273   : > { %755 = vadd.xlane.f32.xlu0 %v754_v19 }
 0x2a7   : > { %v916_v22 = vpop.permute.xlu2 %915 }
 0x2a8   : > { %v918_v23 = vsub.f32 %v2098_v46, %v916_v22  ;;  %v760_v46 = vld [vmem:[#allocation5] sm:$0xff] }
 0x2aa   : > { %v919_v24 = vmul.f32 1.442695, %v918_v23 }
 0x2ac   : > { %1516 = vpow2.f32 %v919_v24 }
 0x2af   : > { %v939_v25 = vpop.permute.xlu2 %938 }
 0x2b0   : > { %v944_v26 = vsel %vm771_vm4, %v939_v25, 0 }
 0x2b1   : > { %953 = vmatpush.bf16.msra.mxu0 %v944_v26 }
 0x2b2   : > { %v1517_v27 = vpop.eup %1516 }
 0x2b3   : > { %v937_v28 = vpack.c.bf16 %v1517_v27, %v1517_v27  ;;  %v924_v29 = vsel %vm633_vm1, %v1517_v27, 0.0  ;;  %v1011_v27 = vld [vmem:[#allocation5 + $0x18] sm:$0xff] }
 0x2b4   : > { %925 = vadd.xlane.f32.xlu1 %v924_v29 }
 0x2b5   : > { %1377 = vmatmul.msk.bf16.vlgmr.msra.gmra.mxu0 %vm633_vm1, %v937_v28 }
 0x2bb   : > { %v832_v30 = vpop.permute.xlu0 %831 }
 0x2bc   : > { %v834_v31 = vsub.f32 %v2094_v41, %v832_v30 }
 0x2be   : > { %v835_v32 = vmul.f32 1.442695, %v834_v31 }
 0x2c0   : > { %1518 = vpow2.f32 %v835_v32 }
 0x2c6   : > { %v1519_v33 = vpop.eup %1518 }
 0x2c7   : > { %v840_v34 = vsel %vm633_vm1, %v1519_v33, 0.0  ;;  %v853_v35 = vpack.c.bf16 %v1519_v33, %v1519_v33 }
 0x2c8   : > { %841 = vadd.xlane.f32.xlu2 %v840_v34 }
 0x2c9   : > { %1375 = vmatmul.msk.bf16.vlgmr.msrb.gmra.mxu2 %vm633_vm1, %v853_v35 }
 0x2cb   : > { %v997_v36 = vpop.permute.xlu1 %996 }
 0x2cc   : > { %v999_v37 = vsub.f32 %v2103_v53, %v997_v36  ;;  %v752_v53 = vld [vmem:[#allocation4] sm:$0xff] }
 0x2cd   : > { %v753_v54 = vmul.f32 %v1513_v17, %v752_v53 }
 0x2ce   : > { %v1000_v38 = vmul.f32 1.442695, %v999_v37 }
 0x2d0   : > { %1520 = vpow2.f32 %v1000_v38 }
 0x2d1   : > { %1522 = vpow2.f32 %v911_v42 }
 0x2d2   : > { %1524 = vpow2.f32 %v992_v52 }
 0x2d3   : > { %v1020_v39 = vpop.permute.xlu1 %1019 }
 0x2d4   : > { %v1025_v40 = vsel %vm771_vm4, %v1020_v39, 0 }
 0x2d5   : > { %v784_v43 = vpop.f32.mrf.mxu0  ;;  %1034 = vmatpush.bf16.msra.mxu2 %v1025_v40 }
 0x2d6   : > { %v1521_v41 = vpop.eup %1520 }
 0x2d7   : > { %v1018_v44 = vpack.c.bf16 %v1521_v41, %v1521_v41  ;;  %v1005_v45 = vsel %vm633_vm1, %v1521_v41, 0.0  ;;  %v1523_v51 = vpop.eup %1522 }
 0x2d8   : > { %1006 = vadd.xlane.f32.xlu0 %v1005_v45  ;;  %v1525_v57 = vpop.eup %1524  ;;  %v923_v62 = vmul.f32 %v1523_v51, %v922_v61 }
 0x2d9   : > { %1379 = vmatmul.msk.bf16.vlgmr.msra.gmra.mxu2 %vm633_vm1, %v1018_v44  ;;  %v1004_v16 = vmul.f32 %v1525_v57, %v1003_v14 }
 0x2db   : > { %v764_v47 = vpop.permute.xlu1 %763 }
 0x2dc   : > { %v766_v48 = vmul.f32 %v764_v47, %v760_v46 }
 0x2dd   : > { %v786_v49 = vpop.f32.mrf.mxu0 }
 0x2de   : > { %v788_v50 = vadd.f32 %v784_v43, %v766_v48 }
 0x2e0   : > { %789 = vst.msk [vmem:[#allocation5] sm:$0xff] %vm633_vm1, %v788_v50  ;;  %933 = vperm.xlu2 %1506, %v1523_v51  }
 0x2e3   : > { %v850_v60 = vpop.permute.xlu1 %849 }
 0x2e4   : > { %v852_v17 = vmul.f32 %v850_v60, %v846_v15 }
 0x2e6   : > { %v756_v55 = vpop.xlane.xlu0 %755 }
 0x2e7   : > { %v757_v56 = vadd.f32 %v756_v55, %v753_v54  ;;  %v1048_v43 = vld [vmem:[#allocation5] sm:$0xff] }
 0x2e9   : > { %759 = vst.msk [vmem:[#allocation4] sm:$0xff] %vm624_vm3, %v757_v56 }
 0x2ec   : > { %1014 = vperm.xlu0 %1504, %v1525_v57  }
 0x2f0   : > { %v1046_v58 = vld [vmem:[#allocation4] sm:$0xff] }
 0x2f1   : > { %1526 = vrcp.f32 %v1046_v58 }
 0x2f7   : > { %v1527_v59 = vpop.eup %1526 }
 0x2f8   : > { %1051 = vperm.xlu1 %1505, %v1527_v59  }
 0x327   : > { %v926_v63 = vpop.xlane.xlu1 %925 }
 0x328   : > { %v927_v0 = vadd.f32 %v926_v63, %v923_v62 }
 0x32a   : > { %928 = vst.msk [vmem:[#allocation4 + $0x10] sm:$0xff] %vm624_vm3, %v927_v0 }
 0x331   : > { %v1064_v1 = vld [vmem:[#allocation4 + $0x10] sm:$0xff] }
 0x332   : > { %v955_v2 = vpop.f32.mrf.mxu0  ;;  %1528 = vrcp.f32 %v1064_v1 }
 0x338   : > { %v1529_v4 = vpop.eup %1528 }
 0x339   : > { %1069 = vperm.xlu2 %1506, %v1529_v4  }
 0x33a   : > { %v957_v5 = vpop.f32.mrf.mxu0 }
 0x33b   : > { %v842_v7 = vpop.xlane.xlu2 %841 }
 0x33c   : > { %v843_v8 = vadd.f32 %v842_v7, %v839_v6 }
 0x33e   : > { %844 = vst.msk [vmem:[#allocation4 + $0x8] sm:$0xff] %vm624_vm3, %v843_v8 }
 0x343   : > { %v934_v10 = vpop.permute.xlu2 %933 }
 0x344   : > { %v936_v11 = vmul.f32 %v934_v10, %v930_v9 }
 0x345   : > { %v1055_v12 = vld [vmem:[#allocation4 + $0x8] sm:$0xff] }
 0x346   : > { %v959_v13 = vadd.f32 %v955_v2, %v936_v11  ;;  %1530 = vrcp.f32 %v1055_v12 }
 0x348   : > { %960 = vst.msk [vmem:[#allocation5 + $0x10] sm:$0xff] %vm633_vm1, %v959_v13 }
 0x34b   : > { %v1007_v19 = vpop.xlane.xlu0 %1006 }
 0x34c   : > { %v1531_v20 = vpop.eup %1530  ;;  %v1008_v21 = vadd.f32 %v1007_v19, %v1004_v16  ;;  %v874_v18 = vpop.f32.mrf.mxu2 }
 0x34d   : > { %v878_v22 = vadd.f32 %v874_v18, %v852_v17  ;;  %1060 = vperm.xlu0 %1504, %v1531_v20  }
 0x34e   : > { %1009 = vst.msk [vmem:[#allocation4 + $0x18] sm:$0xff] %vm624_vm3, %v1008_v21 }
 0x34f   : > { %879 = vst.msk [vmem:[#allocation5 + $0x8] sm:$0xff] %vm633_vm1, %v878_v22  ;;  %v1066_v32 = vld [vmem:[#allocation5 + $0x10] sm:$0xff] }
 0x354   : > { %v876_v23 = vpop.f32.mrf.mxu2 }
 0x355   : > { %v1073_v24 = vld [vmem:[#allocation4 + $0x18] sm:$0xff] }
 0x356   : > { %1532 = vrcp.f32 %v1073_v24  ;;  %v1057_v35 = vld [vmem:[#allocation5 + $0x8] sm:$0xff] }
 0x35c   : > { %v1533_v25 = vpop.eup %1532  ;;  %v1036_v26 = vpop.f32.mrf.mxu2 }
 0x35d   : > { %1078 = vperm.xlu0 %1504, %v1533_v25  }
 0x35e   : > { %v1015_v28 = vpop.permute.xlu0 %1014 }
 0x35f   : > { %v1017_v29 = vmul.f32 %v1015_v28, %v1011_v27 }
 0x361   : > { %v1040_v30 = vadd.f32 %v1036_v26, %v1017_v29 }
 0x363   : > { %1041 = vst.msk [vmem:[#allocation5 + $0x18] sm:$0xff] %vm633_vm1, %v1040_v30 }
 0x364   : > { %v1038_v31 = vpop.f32.mrf.mxu2 }
 0x36a   : > { %v1075_v38 = vld [vmem:[#allocation5 + $0x18] sm:$0xff]  ;;  %v1052_v42 = vpop.permute.xlu1 %1051 }
 0x36b   : > { %v1054_v44 = vmul.f32 %v1052_v42, %v1048_v43 }
 0x393   : > { %v1070_v33 = vpop.permute.xlu2 %1069 }
 0x394   : > { %v1072_v34 = vmul.f32 %v1070_v33, %v1066_v32 }
 0x396   : > { %1087 = vrot.lane.b32.xlu1 %v1072_v34, %s1821_s16 }
 0x3bf   : > { %v1061_v36 = vpop.permute.xlu0 %1060 }
 0x3c0   : > { %v1063_v37 = vmul.f32 %v1061_v36, %v1057_v35 }
 0x3c2   : > { %1083 = vrot.lane.b32.xlu2 %v1063_v37, %s1822_s14 }
 0x3cf   : > { %v1079_v39 = vpop.permute.xlu0 %1078 }
 0x3d0   : > { %v1081_v40 = vmul.f32 %v1079_v39, %v1075_v38 }
 0x3d2   : > { %1091 = vrot.lane.b32.xlu0 %v1081_v40, %s1823_s26 }
 0x408   : > { %v1088_v46 = vpop.permute.xlu1 %1087 }
 0x41c   : > { %v1084_v41 = vpop.permute.xlu2 %1083 }
 0x41d   : > { %v1094_v45 = vsel %vm633_vm1, %v1054_v44, %v1084_v41 }
 0x41e   : > { %v1096_v48 = vsel %vm1095_vm5, %v1094_v45, %v1088_v46 }
 0x444   : > { %v1092_v47 = vpop.permute.xlu0 %1091 }
 0x445   : > { %v1098_v49 = vsel %vm1097_vm6, %v1096_v48, %v1092_v47 }
 0x446   : > { %1099 = vst.msk [vmem:[%s567_s7] sm:$0xff] %vm603_vm0, %v1098_v49 }
 0x447   : > { %1741 = shalt.err (!%p1738_p13)
}
 0x448   : > { %1408 = dma.vmem_to_hbm [thread:$0]  (%p1954_p4), %s1116_s12, 128, %s1118_s19, %s1101_s29  }
 0x449 PF: > { %s2252_s17 = sld [smem:[#allocation23_spill]]  ;;  %p1431_p0 = pnand %p1330_p6, %p1962_p9 }
 0x44a   : > { %s2254_s20 = sld [smem:[#allocation26_spill]] }
 0x44b   : > { %p1432_p2 = pneg %p1431_p0 }
 0x44f   : > { %s1129_s16 = sand.u32 1, %s2252_s17  }
 0x450   : > { %s1130_s14 = scalar_lea.sflag [#allocation8], %s1129_s16 }
 0x451   : > { %1783 = dma.done.wait (%p1432_p2), %s1130_s14, 128  }
 0x452   : > { %1785 = vsyncadd (%p1432_p2), %s1130_s14, 4294967168  ;;  %s30_s14 = sadd.s32 1, %s2254_s20   ;;  %s2255_s26 = sld [smem:[#allocation29_spill]] }
 0x453   : > { %p27_p7 = scmp.ge.s32.totalorder %s30_s14, 4   ;;  %s2256_s12 = sld [smem:[#allocation25_spill]] }
 0x454   : > { %s2257_s13 = sld [smem:[#allocation27_spill]]  ;;  %s2258_s30 = smov %s1792_s10 }
 0x455   : > { %s2259_s10 = smov %s1796_s11  ;;  %29 = sbr.rel (!%p27_p7) target bundleno = 16 (0x10), region = 166 }
 0x458   : > { %s2260_s11 = smov %s2255_s26 }
 0x45a   :  { %1136 = vsyncpa [#allocation7], 1 }
 0x45b   :  { %1138 = vsyncpa [#allocation7 + $0x1], 1 }
 0x45c   :  { %1139 = vsyncpa [#allocation10], 1 }
 0x45d   :  { %1141 = vsyncpa [#allocation10 + $0x1], 1 }
 0x45e   :  { %1142 = vsyncpa [#allocation13], 1 }
 0x45f   :  { %1143 = vsyncpa [#allocation16], 1 }
 0x460   :  { %1144 = vsyncpa [#allocation8], 1 }
 0x461   :  { %1146 = vsyncpa [#allocation8 + $0x1], 1 }

</bundles_post_ra>
